<compile_context>
chip_gen: v5e
topology: v5e:2x2
jax: 0.10.0
libtpu: 0.0.40
codegen_flags: <defaults>
</compile_context>

<pallas_src>
import math

import jax
import jax.numpy as jnp
import numpy as np
from jax.experimental import pallas as pl
from jax.experimental.pallas import tpu as pltpu

_LANES = 128
_SUBLANES = 8


def _round_up(x, m):
    return ((x + m - 1) // m) * m


def _embedding_kernel_onehot(idx_ref, off_ref, table_ref, out_ref):
    """Small-vocabulary path: one fused one-hot @ table MXU contraction.

    idx_ref:   (tile_b, F)      int32  raw per-field indices for this batch tile
    off_ref:   (1, F)           int32  per-field vocabulary offsets
    table_ref: (V, D)           float  full embedding table (VMEM resident)
    out_ref:   (tile_b, FD_pad) f32    lane-dense output tile (FD_pad % 128 == 0)
    """
    tile_b, F = idx_ref.shape
    V, D = table_ref.shape
    fd = F * D
    fd_pad = out_ref.shape[-1]

    # Offset add (the `x + offsets` of the PyTorch forward): pure VPU work,
    # sublane-broadcast of the tiny (1, F) offset row.
    idx = idx_ref[...] + off_ref[...]                          # (tile_b, F) int32
    table = table_ref[...]                                     # (V, D)

    # Hoisted iota (JAX does not CSE broadcast_in_dim inside loops).
    iota_v = jax.lax.broadcasted_iota(jnp.int32, (tile_b, V), 1)

    # Field-major one-hot: rows [f*tile_b : (f+1)*tile_b) select field f.
    # Major-dim (sublane-aligned) concat of F (tile_b, V) pieces.
    # NOTE: an out-of-range index gives an all-zero row -> zero embedding
    # (torch.nn.Embedding would raise); indices must be in range.
    one_hot = jnp.concatenate(
        [(iota_v == idx[:, f:f + 1]).astype(table.dtype) for f in range(F)],
        axis=0)                                                # (F*tile_b, V)

    # ONE MXU contraction for all F fields: single RHS (table) push, single
    # result drain, M = F*tile_b keeps the systolic array fed.
    emb = jnp.dot(one_hot, table,
                  preferred_element_type=jnp.float32)          # (F*tile_b, D)

    # Assemble the lane-dense row in registers: static sublane slices per field
    # + lane concat (+ zero pad up to FD_pad), then ONE full-width unmasked
    # store instead of F masked D-lane stores.
    pieces = [emb[f * tile_b:(f + 1) * tile_b, :] for f in range(F)]
    if fd_pad != fd:
        pieces.append(jnp.zeros((tile_b, fd_pad - fd), jnp.float32))
    out_ref[...] = jnp.concatenate(pieces, axis=1).astype(out_ref.dtype)


def _embedding_kernel_gather(idx_ref, off_ref, table_ref, out_ref):
    """Moderate-vocabulary path (table still VMEM resident): plain row gather.

    Avoids the O(B*F*V*D) one-hot flops and the (tile_b, V) temporaries; the
    kernel is mem-bound at the useful byte count.  (Not exercised by the demo
    shapes below, which stay on the one-hot path.)
    """
    tile_b, F = idx_ref.shape
    V, D = table_ref.shape
    fd = F * D
    fd_pad = out_ref.shape[-1]

    idx = idx_ref[...] + off_ref[...]                          # (tile_b, F)
    table = table_ref[...]
    pieces = [jnp.take(table, idx[:, f], axis=0) for f in range(F)]
    if fd_pad != fd:
        pieces.append(jnp.zeros((tile_b, fd_pad - fd), table.dtype))
    out_ref[...] = jnp.concatenate(pieces, axis=1).astype(out_ref.dtype)


def _vmem_budget_bytes():
    """Per-core VMEM budget with headroom (v5e/v6e: 128 MiB, v7x: 64 MiB/core)."""
    try:
        cap = int(pltpu.get_tpu_info().vmem_capacity_bytes)
    except Exception:  # best-effort hardware query
        cap = 64 << 20  # conservative default: v7x per-TensorCore capacity
    return int(cap * 3 // 4)  # leave headroom for compiler-internal scratch


def features_embedding_forward(x, offsets, table, *, tile_b=None,
                               onehot_max_vocab=1024):
    """x: (B, F) int, offsets: (F,) int, table: (V, D) float -> (B, F, D) f32."""
    B, F = x.shape
    V, D = table.shape
    fd = F * D
    fd_pad = _round_up(fd, _LANES)            # lane-dense flat output width
    tbytes = jnp.dtype(table.dtype).itemsize

    use_onehot = V <= onehot_max_vocab
    kernel = _embedding_kernel_onehot if use_onehot else _embedding_kernel_gather

    # ---- batch tile selection ------------------------------------------------
    # Default large enough that the per-step output tile amortizes the ~0.35 us
    # per-grid-step overhead; never default to tiny tiles.
    if tile_b is None:
        tile_b = 512
    tile_b = max(_SUBLANES, min(_round_up(tile_b, _SUBLANES),
                                _round_up(B, _SUBLANES)))

    budget = _vmem_budget_bytes()

    def vmem_need(tb):
        # resident table + double-buffered idx/out tiles + matmul temporaries,
        # counted at padded lane width, + fixed headroom.
        need = V * _round_up(D, _LANES) * tbytes           # resident table
        need += 2 * tb * _LANES * 4                        # idx tiles (x2 buffers)
        need += 2 * tb * fd_pad * 4                        # out tiles (x2 buffers)
        need += F * tb * _round_up(D, _LANES) * 4          # emb temporary
        if use_onehot:
            need += F * tb * _round_up(V, _LANES) * 4      # one-hot temporary
        return need + (2 << 20)

    # Shrink the tile (never silently under-provision) until it fits.
    while tile_b > _SUBLANES and vmem_need(tile_b) > budget:
        tile_b = max(_SUBLANES, _round_up(tile_b // 2, _SUBLANES))
    if vmem_need(tile_b) > budget:
        # TODO(synk): table larger than VMEM -> DMA row gather (memory_space=
        # pl.ANY + make_async_copy / PrefetchScalarGridSpec); not implemented.
        raise NotImplementedError(
            "embedding table does not fit in VMEM; HBM gather path not implemented")

    # v7x megacore: keep an even number of batch tiles when the grid is > 1 so
    # the "parallel" axis splits evenly across the two TensorCores.
    n_tiles = pl.cdiv(B, tile_b)
    if n_tiles > 1 and n_tiles % 2:
        n_tiles += 1
        tile_b = max(_SUBLANES, _round_up(pl.cdiv(B, n_tiles), _SUBLANES))
        n_tiles = pl.cdiv(B, tile_b)
    Bp = n_tiles * tile_b

    # ---- operands --------------------------------------------------------------
    x_i32 = x.astype(jnp.int32)
    if Bp != B:
        # Padded rows hold index 0 -> table row offsets[f]: valid and harmless,
        # sliced off below.  (Do NOT change this to an out-of-range sentinel.)
        x_i32 = jnp.pad(x_i32, ((0, Bp - B), (0, 0)))
    off2d = offsets.astype(jnp.int32).reshape(1, F)

    cost = pl.CostEstimate(
        flops=(2 * Bp * F * V * D) if use_onehot else 0,
        transcendentals=0,
        bytes_accessed=(V * D * tbytes            # table fetched once (const index_map)
                        + Bp * F * 4 + F * 4      # indices + offsets
                        + Bp * fd_pad * 4),       # lane-dense flat output
    )

    out_flat = pl.pallas_call(
        kernel,
        out_shape=jax.ShapeDtypeStruct((Bp, fd_pad), jnp.float32),
        grid=(n_tiles,),
        in_specs=[
            pl.BlockSpec((tile_b, F), lambda i: (i, 0)),   # idx tile (pipelined)
            pl.BlockSpec((1, F), lambda i: (0, 0)),        # offsets (tiny, constant)
            pl.BlockSpec((V, D), lambda i: (0, 0)),        # table (VMEM resident)
        ],
        out_specs=pl.BlockSpec((tile_b, fd_pad), lambda i: (i, 0)),  # lane-dense
        compiler_params=pltpu.CompilerParams(
            dimension_semantics=("parallel",),             # megacore-shardable
            vmem_limit_bytes=int(min(budget, max(vmem_need(tile_b), 16 << 20))),
        ),
        cost_estimate=cost,
    )(x_i32, off2d, table)

    return out_flat[:B, :fd].reshape(B, F, D)


def make_params(field_dims, embed_dim, key):
    """Deterministic synthetic params matching the PyTorch __init__."""
    V = int(sum(field_dims))
    # torch.nn.init.xavier_uniform_ on a (V, D) weight: bound = sqrt(6 / (V + D)).
    bound = math.sqrt(6.0 / (V + embed_dim))
    table = jax.random.uniform(key, (V, embed_dim), jnp.float32,
                               minval=-bound, maxval=bound)
    offsets = jnp.asarray(
        np.array((0, *np.cumsum(field_dims)[:-1]), dtype=np.int32))
    return table, offsets


if __name__ == "__main__":
    field_dims = (5, 7, 4, 8)          # sum = 24 vocabulary rows
    embed_dim = 32                     # F * D = 128 -> zero-pad lane-dense output
    num_fields = len(field_dims)

    key = jax.random.PRNGKey(0)
    k_table, k_x1, k_x2 = jax.random.split(key, 3)
    table, offsets = make_params(field_dims, embed_dim, k_table)
    maxvals = jnp.asarray(field_dims, dtype=jnp.int32)[None, :]    # (1, F)

    def run_check(batch, k, tile_b=None):
        # raw per-field indices in [0, field_dims[f])
        x = (jax.random.randint(k, (batch, num_fields), 0, 10_000, jnp.int32)
             % maxvals).astype(jnp.int32)
        out = jax.block_until_ready(
            features_embedding_forward(x, offsets, table, tile_b=tile_b))
        assert out.shape == (batch, num_fields, embed_dim)
        # pure-JAX reference (same semantics as the PyTorch forward)
        ref = jnp.take(table, x + offsets[None, :], axis=0)
        np.testing.assert_allclose(np.asarray(out), np.asarray(ref),
                                   rtol=1e-6, atol=1e-6)

    run_check(20, k_x1)                # single balanced tile, batch padded 20 -> 24
    run_check(100, k_x2, tile_b=24)    # multi-step pipelined grid + batch padding
    print("KERNEL_OK")
</pallas_src>

<mosaic_0001>
module attributes {stable_mosaic.version = 11 : i64} {
  func.func @_embedding_kernel_onehot(%arg0: i32, %arg1: memref<24x4xi32, #tpu.memory_space<vmem>>, %arg2: memref<1x4xi32, #tpu.memory_space<vmem>>, %arg3: memref<24x32xf32, #tpu.memory_space<vmem>>, %arg4: memref<24x128xf32, #tpu.memory_space<vmem>>) attributes {dimension_semantics = [#tpu.dimension_semantics<parallel>], iteration_bounds = array<i64: 1>, scalar_prefetch = 0 : i64, scratch_operands = 0 : i64, tpu.core_type = #tpu.core_type<tc>, window_params = [{transform_indices = @transform_0, window_bounds = array<i64: 24, 4>}, {pipeline_mode = #tpu.pipeline_mode<synchronous>, transform_indices = @transform_1, window_bounds = array<i64: 1, 4>}, {pipeline_mode = #tpu.pipeline_mode<synchronous>, transform_indices = @transform_2, window_bounds = array<i64: 24, 32>}, {transform_indices = @transform_3, window_bounds = array<i64: 24, 128>}]} {
    %c0 = arith.constant 0 : index
    %c0_0 = arith.constant 0 : index
    %0 = vector.load %arg1[%c0, %c0_0] : memref<24x4xi32, #tpu.memory_space<vmem>>, vector<24x4xi32>
    %c0_1 = arith.constant 0 : index
    %c0_2 = arith.constant 0 : index
    %1 = vector.load %arg2[%c0_1, %c0_2] : memref<1x4xi32, #tpu.memory_space<vmem>>, vector<1x4xi32>
    %2 = vector.broadcast %1 : vector<1x4xi32> to vector<24x4xi32>
    %3 = arith.addi %0, %2 : vector<24x4xi32>
    %c0_3 = arith.constant 0 : index
    %c0_4 = arith.constant 0 : index
    %4 = vector.load %arg3[%c0_3, %c0_4] : memref<24x32xf32, #tpu.memory_space<vmem>>, vector<24x32xf32>
    %5 = tpu.iota {dimensions = array<i32: 1>} : vector<24x24xi32>
    %6 = vector.extract_strided_slice %3 {offsets = [0, 0], sizes = [24, 1], strides = [1, 1]} : vector<24x4xi32> to vector<24x1xi32>
    %7 = vector.broadcast %6 : vector<24x1xi32> to vector<24x24xi32>
    %8 = arith.cmpi eq, %5, %7 : vector<24x24xi32>
    %9 = arith.extui %8 : vector<24x24xi1> to vector<24x24xi32>
    %10 = arith.sitofp %9 : vector<24x24xi32> to vector<24x24xf32>
    %11 = vector.extract_strided_slice %3 {offsets = [0, 1], sizes = [24, 1], strides = [1, 1]} : vector<24x4xi32> to vector<24x1xi32>
    %12 = vector.broadcast %11 : vector<24x1xi32> to vector<24x24xi32>
    %13 = arith.cmpi eq, %5, %12 : vector<24x24xi32>
    %14 = arith.extui %13 : vector<24x24xi1> to vector<24x24xi32>
    %15 = arith.sitofp %14 : vector<24x24xi32> to vector<24x24xf32>
    %16 = vector.extract_strided_slice %3 {offsets = [0, 2], sizes = [24, 1], strides = [1, 1]} : vector<24x4xi32> to vector<24x1xi32>
    %17 = vector.broadcast %16 : vector<24x1xi32> to vector<24x24xi32>
    %18 = arith.cmpi eq, %5, %17 : vector<24x24xi32>
    %19 = arith.extui %18 : vector<24x24xi1> to vector<24x24xi32>
    %20 = arith.sitofp %19 : vector<24x24xi32> to vector<24x24xf32>
    %21 = vector.extract_strided_slice %3 {offsets = [0, 3], sizes = [24, 1], strides = [1, 1]} : vector<24x4xi32> to vector<24x1xi32>
    %22 = vector.broadcast %21 : vector<24x1xi32> to vector<24x24xi32>
    %23 = arith.cmpi eq, %5, %22 : vector<24x24xi32>
    %24 = arith.extui %23 : vector<24x24xi1> to vector<24x24xi32>
    %25 = arith.sitofp %24 : vector<24x24xi32> to vector<24x24xf32>
    %26 = tpu.concatenate %10, %15, %20, %25 in 0 : vector<24x24xf32>, vector<24x24xf32>, vector<24x24xf32>, vector<24x24xf32> -> vector<96x24xf32>
    %cst = arith.constant dense<0.000000e+00> : vector<96x32xf32>
    %27 = tpu.matmul %26, %4, %cst {dimension_numbers = #tpu.dot_dimension_numbers<[1], [0], [0], [1], [0, 0, 1, 1], [], []>} : vector<96x24xf32>, vector<24x32xf32>, vector<96x32xf32> -> vector<96x32xf32>
    %28 = vector.extract_strided_slice %27 {offsets = [0, 0], sizes = [24, 32], strides = [1, 1]} : vector<96x32xf32> to vector<24x32xf32>
    %29 = vector.extract_strided_slice %27 {offsets = [24, 0], sizes = [24, 32], strides = [1, 1]} : vector<96x32xf32> to vector<24x32xf32>
    %30 = vector.extract_strided_slice %27 {offsets = [48, 0], sizes = [24, 32], strides = [1, 1]} : vector<96x32xf32> to vector<24x32xf32>
    %31 = vector.extract_strided_slice %27 {offsets = [72, 0], sizes = [24, 32], strides = [1, 1]} : vector<96x32xf32> to vector<24x32xf32>
    %32 = tpu.concatenate %28, %29, %30, %31 in 1 : vector<24x32xf32>, vector<24x32xf32>, vector<24x32xf32>, vector<24x32xf32> -> vector<24x128xf32>
    %c0_5 = arith.constant 0 : index
    %c0_6 = arith.constant 0 : index
    %33 = vector.load %arg4[%c0_5, %c0_6] : memref<24x128xf32, #tpu.memory_space<vmem>>, vector<24x128xf32>
    tpu.vector_store %arg4[%c0_5, %c0_6], %32 {strides = array<i32>} : memref<24x128xf32, #tpu.memory_space<vmem>>, vector<24x128xf32>,
    return
  }
  func.func @transform_0(%arg0: i32) -> (i32, i32) {
    %c0_i32 = arith.constant 0 : i32
    %c0_i32_0 = arith.constant 0 : i32
    return %arg0, %c0_i32 : i32, i32
  }
  func.func @transform_1(%arg0: i32) -> (i32, i32) {
    %c0_i32 = arith.constant 0 : i32
    %c0_i32_0 = arith.constant 0 : i32
    %c0_i32_1 = arith.constant 0 : i32
    return %c0_i32, %c0_i32_0 : i32, i32
  }
  func.func @transform_2(%arg0: i32) -> (i32, i32) {
    %c0_i32 = arith.constant 0 : i32
    %c0_i32_0 = arith.constant 0 : i32
    %c0_i32_1 = arith.constant 0 : i32
    return %c0_i32, %c0_i32_0 : i32, i32
  }
  func.func @transform_3(%arg0: i32) -> (i32, i32) {
    %c0_i32 = arith.constant 0 : i32
    %c0_i32_0 = arith.constant 0 : i32
    return %arg0, %c0_i32 : i32, i32
  }
}

</mosaic_0001>

<bundles_post_ra>
// kernel: tpu_custom_call.1
= control target key start
LH: loop header
LB: loop body
LE: loop exit
PB: predicated region body
PF: predicated region fallthrough
CT: control target
= control target key end

     0   :  { %v341_v1 = vmov 2   ;;  %v342_v2 = vmov 1   ;;  %v343_v5 = vmov 3   ;;  %s417_s0 = inlined_call_operand.vmem [shape: s32[24,4], index: 0, kind: input, shape index: {}]   ;;  %s418_s1 = inlined_call_operand.vmem [shape: s32[1,4], index: 1, kind: input, shape index: {}]   ;;  %s419_s2 = inlined_call_operand.vmem [shape: f32[24,32], index: 2, kind: input, shape index: {}]   ;;  %s420_s3 = inlined_call_operand.hbm [shape: f32[24,128], index: 3, kind: output, shape index: {}]  }
   0x1   :  { %v15_v0 = vld [vmem:[%s417_s0] sm:$0xff]  ;;  %303 = vset.pattern.permute.xlu0 %v341_v1  ;;  %305 = vset.pattern.permute.xlu1 %v342_v2  ;;  %v16_v4 = vld [vmem:[%s417_s0 + $0x8] sm:$0xff]  ;;  %v25_v6 = vld [vmem:[%s419_s2 + $0x10] sm:$0xff] }
   0x2   :  { %v314_v3 = vld [vmem:[%s418_s1] ss:$0 sm:$0xff]  ;;  %307 = vset.pattern.permute.xlu2 %v343_v5 }
   0x3   :  { %8 = vsyncpa [#allocation3], 0  ;;  %v20_v7 = vadd.s32 %v314_v3, %v15_v0  ;;  %283 = vmatpush.msra.mxu1 %v25_v6  ;;  %284 = vmatpush.msra.mxu2 %v25_v6  ;;  %v24_v8 = vld [vmem:[%s419_s2 + $0x8] sm:$0xff]  ;;  %v21_v9 = vadd.s32 %v314_v3, %v16_v4  ;;  %v17_v10 = vld [vmem:[%s417_s0 + $0x10] sm:$0xff]  ;;  %v344_v12 = vmov 0   ;;  %v26_v15 = vlaneseq  ;;  %s346_s0 = smov 32  }
   0x4   :  { %285 = vmatpush.msra.mxu3 %v25_v6  ;;  %150 = vmatpush.msra.mxu0 %v25_v6  ;;  %v22_v11 = vadd.s32 %v314_v3, %v17_v10  ;;  %v23_v13 = vld [vmem:[%s419_s2] sm:$0xff]  ;;  %vm100_vm0 = vcmask 195584   ;;  %v345_v19 = vmov 0.0   ;;  %s347_s2 = smov 64   ;;  %s348_s25 = smov 96   ;;  %vm226_vm13 = vcmask 261120  }
   0x5   :  { %47 = vperm.xlu1 %305, %v20_v7   ;;  %65 = vperm.xlu0 %303, %v20_v7   ;;  %v27_v16 = vand.u32 127, %v26_v15  ;;  %vm230_vm14 = vcmask 523264   ;;  %vm234_vm15 = vcmask 785408   ;;  %s349_s26 = smov [#allocation2]   ;;  %s247_s30 = sshll.u32 %s420_s3, 4  ;;  %s248_s30 = int_to_ptr.hbm [resolvable:$true] %s247_s30 }
   0x6   :  { %86 = vperm.xlu2 %307, %v21_v9   ;;  %286 = vmatpush.msra.mxu1 %v24_v8  ;;  %s245_s27 = sshll.u32 %s349_s26, 4  ;;  %s350_s4 = smov 128   ;;  %s246_s27 = int_to_ptr.vmem [resolvable:$true] %s245_s27 }
   0x7   :  { %287 = vmatpush.msra.mxu2 %v24_v8  ;;  %288 = vmatpush.msra.mxu3 %v24_v8  ;;  %s351_s5 = smov 8  }
   0x8   :  { %151 = vmatpush.msra.mxu0 %v24_v8  ;;  %289 = vmatpush.msra.mxu1 %v23_v13 }
   0x9   :  { %290 = vmatpush.msra.mxu2 %v23_v13  ;;  %291 = vmatpush.msra.mxu3 %v23_v13 }
   0xa   :  { %152 = vmatpush.msra.mxu0 %v23_v13 }
   0xd   :  { %306 = vset.pattern.permute.xlu1 %v341_v1  ;;  %304 = vset.pattern.permute.xlu0 %v343_v5 }
   0xe   :  { %68 = vperm.xlu1 %306, %v21_v9   ;;  %83 = vperm.xlu0 %304, %v20_v7  }
   0xf   :  { %308 = vset.pattern.permute.xlu2 %v342_v2 }
  0x10   :  { %50 = vperm.xlu2 %308, %v21_v9  }
  0x16   :  { %71 = vperm.xlu1 %306, %v22_v11   ;;  %310 = vset.pattern.permute.xlu0 %v342_v2 }
  0x17   :  { %53 = vperm.xlu0 %310, %v22_v11  }
  0x18   :  { %309 = vset.pattern.permute.xlu2 %v343_v5 }
  0x19   :  { %89 = vperm.xlu2 %309, %v22_v11  }
  0x1e   :  { %311 = vset.pattern.permute.xlu1 %v344_v12 }
  0x1f   :  { %29 = vperm.xlu1 %311, %v20_v7   ;;  %313 = vset.pattern.permute.xlu0 %v343_v5 }
  0x21   :  { %312 = vset.pattern.permute.xlu2 %v344_v12 }
  0x22   :  { %32 = vperm.xlu2 %312, %v21_v9  }
  0x27   :  { %35 = vperm.xlu1 %311, %v22_v11  }
  0x60   :  { %v87_v14 = vpop.permute.xlu2 %86 }
  0x61   :  { %vm92_vm6 = vcmp.eq.s32.totalorder %v27_v16, %v87_v14 }
  0x62   :  { %v269_v30 = vsel %vm92_vm6, 1.0, %v345_v19 }
  0x6a   :  { %v51_v22 = vpop.permute.xlu2 %50 }
  0x6b   :  { %vm56_vm3 = vcmp.eq.s32.totalorder %v27_v16, %v51_v22 }
  0x6c   :  { %v263_v23 = vsel %vm56_vm3, 1.0, %v345_v19 }
  0x73   :  { %v90_v32 = vpop.permute.xlu2 %89 }
  0x74   :  { %vm93_vm9 = vcmp.eq.s32.totalorder %v27_v16, %v90_v32 }
  0x75   :  { %v270_v34 = vsel %vm93_vm9, 1.0, %v345_v19 }
  0x77   :  { %v48_v17 = vpop.permute.xlu1 %47  ;;  %v66_v18 = vpop.permute.xlu0 %65 }
  0x78   :  { %vm55_vm1 = vcmp.eq.s32.totalorder %v27_v16, %v48_v17  ;;  %vm73_vm2 = vcmp.eq.s32.totalorder %v27_v16, %v66_v18 }
  0x79   :  { %v262_v20 = vsel %vm55_vm1, 1.0, %v345_v19  ;;  %v265_v21 = vsel %vm73_vm2, 1.0, %v345_v19 }
  0x7a   :  { %274 = vmatmul.msk.f32.vlgmr.msra.gmra.mxu1 %vm100_vm0, %v262_v20  ;;  %277 = vmatmul.msk.f32.vlgmr.msra.gmra.mxu2 %vm100_vm0, %v265_v21 }
  0x7c   :  { %v33_v37 = vpop.permute.xlu2 %32 }
  0x7d   :  { %vm38_vm11 = vcmp.eq.s32.totalorder %v27_v16, %v33_v37 }
  0x7e   :  { %v260_v38 = vsel %vm38_vm11, 1.0, %v345_v19 }
  0x80   :  { %v69_v24 = vpop.permute.xlu1 %68  ;;  %v84_v25 = vpop.permute.xlu0 %83 }
  0x81   :  { %vm74_vm4 = vcmp.eq.s32.totalorder %v27_v16, %v69_v24  ;;  %vm91_vm5 = vcmp.eq.s32.totalorder %v27_v16, %v84_v25 }
  0x82   :  { %v266_v26 = vsel %vm74_vm4, 1.0, %v345_v19  ;;  %v268_v27 = vsel %vm91_vm5, 1.0, %v345_v19  ;;  %275 = vmatmul.msk.f32.gmra.mxu1 %vm100_vm0, %v263_v23 }
  0x83   :  { %278 = vmatmul.msk.f32.gmra.mxu2 %vm100_vm0, %v266_v26  ;;  %280 = vmatmul.msk.f32.vlgmr.msra.gmra.mxu3 %vm100_vm0, %v268_v27 }
  0x88   :  { %v72_v28 = vpop.permute.xlu1 %71 }
  0x89   :  { %vm75_vm7 = vcmp.eq.s32.totalorder %v27_v16, %v72_v28  ;;  %v54_v29 = vpop.permute.xlu0 %53 }
  0x8a   :  { %v267_v31 = vsel %vm75_vm7, 1.0, %v345_v19  ;;  %vm57_vm8 = vcmp.eq.s32.totalorder %v27_v16, %v54_v29 }
  0x8b   :  { %v264_v33 = vsel %vm57_vm8, 1.0, %v345_v19  ;;  %279 = vmatmul.msk.f32.gmra.mxu2 %vm100_vm0, %v267_v31  ;;  %281 = vmatmul.msk.f32.gmra.mxu3 %vm100_vm0, %v269_v30 }
  0x8c   :  { %276 = vmatmul.msk.f32.gmra.mxu1 %vm100_vm0, %v264_v33 }
  0x91   :  { %v30_v35 = vpop.permute.xlu1 %29 }
  0x92   :  { %vm37_vm10 = vcmp.eq.s32.totalorder %v27_v16, %v30_v35 }
  0x93   :  { %282 = vmatmul.msk.f32.gmra.mxu3 %vm100_vm0, %v270_v34  ;;  %v259_v36 = vsel %vm37_vm10, 1.0, %v345_v19 }
  0x94   :  { %271 = vmatmul.msk.f32.vlgmr.msra.gmra.mxu0 %vm100_vm0, %v259_v36 }
  0x99   :  { %v36_v39 = vpop.permute.xlu1 %35 }
  0x9a   :  { %vm39_vm12 = vcmp.eq.s32.totalorder %v27_v16, %v36_v39 }
  0x9b   :  { %v261_v40 = vsel %vm39_vm12, 1.0, %v345_v19 }
  0x9c   :  { %272 = vmatmul.msk.f32.gmra.mxu0 %vm100_vm0, %v260_v38 }
  0xa4   :  { %273 = vmatmul.msk.f32.gmra.mxu0 %vm100_vm0, %v261_v40 }
  0xf7   :  { %v163_v41 = vpop.f32.mrf.mxu1 }
  0xf8   :  { %193 = vrot.lane.b32.xlu2 %v163_v41, %s346_s0 }
  0xfd   :  { %v172_v42 = vpop.f32.mrf.mxu2 }
  0xff   :  { %v166_v43 = vpop.f32.mrf.mxu1 }
 0x100   :  { %195 = vrot.lane.b32.xlu0 %v166_v43, %s346_s0  ;;  %205 = vrot.lane.b32.xlu2 %v172_v42, %s347_s2 }
 0x106   :  { %v175_v44 = vpop.f32.mrf.mxu2  ;;  %v181_v45 = vpop.f32.mrf.mxu3 }
 0x108   :  { %207 = vrot.lane.b32.xlu0 %v175_v44, %s347_s2  ;;  %217 = vrot.lane.b32.xlu2 %v181_v45, %s348_s25 }
 0x109   :  { %v169_v46 = vpop.f32.mrf.mxu1 }
 0x10a   :  { %197 = vrot.lane.b32.xlu1 %v169_v46, %s346_s0 }
 0x10e   :  { %v184_v47 = vpop.f32.mrf.mxu3  ;;  %v178_v48 = vpop.f32.mrf.mxu2 }
 0x110   :  { %219 = vrot.lane.b32.xlu0 %v184_v47, %s348_s25 }
 0x111   :  { %v154_v52 = vpop.f32.mrf.mxu0 }
 0x112   :  { %209 = vrot.lane.b32.xlu1 %v178_v48, %s347_s2 }
 0x116   :  { %v187_v49 = vpop.f32.mrf.mxu3 }
 0x119   :  { %v157_v60 = vpop.f32.mrf.mxu0 }
 0x11a   :  { %221 = vrot.lane.b32.xlu1 %v187_v49, %s348_s25 }
 0x121   :  { %v160_v2 = vpop.f32.mrf.mxu0 }
 0x152   :  { %v194_v50 = vpop.permute.xlu2 %193 }
 0x153   :  { %v227_v53 = vsel %vm226_vm13, %v154_v52, %v194_v50 }
 0x15a   :  { %v206_v51 = vpop.permute.xlu2 %205 }
 0x15b   :  { %v231_v54 = vsel %vm230_vm14, %v227_v53, %v206_v51 }
 0x162   :  { %v218_v55 = vpop.permute.xlu2 %217 }
 0x163   :  { %v235_v56 = vsel %vm234_vm15, %v231_v54, %v218_v55 }
 0x164   :  { %238 = vst [vmem:[#allocation2] sm:$0xff] %v235_v56 }
 0x172   :  { %v196_v57 = vpop.permute.xlu0 %195 }
 0x173   :  { %v228_v61 = vsel %vm226_vm13, %v157_v60, %v196_v57 }
 0x17a   :  { %v208_v58 = vpop.permute.xlu0 %207 }
 0x17b   :  { %v232_v62 = vsel %vm230_vm14, %v228_v61, %v208_v58 }
 0x17c   :  { %v198_v59 = vpop.permute.xlu1 %197 }
 0x17d   :  { %v229_v3 = vsel %vm226_vm13, %v160_v2, %v198_v59 }
 0x182   :  { %v220_v63 = vpop.permute.xlu0 %219 }
 0x183   :  { %v236_v0 = vsel %vm234_vm15, %v232_v62, %v220_v63 }
 0x184   :  { %239 = vst [vmem:[#allocation2 + $0x8] sm:$0xff] %v236_v0  ;;  %v210_v1 = vpop.permute.xlu1 %209 }
 0x185   :  { %v233_v4 = vsel %vm230_vm14, %v229_v3, %v210_v1 }
 0x18c   :  { %v222_v5 = vpop.permute.xlu1 %221 }
 0x18d   :  { %v237_v6 = vsel %vm234_vm15, %v233_v4, %v222_v5 }
 0x18e   :  { %240 = vst [vmem:[#allocation2 + $0x10] sm:$0xff] %v237_v6 }
 0x18f   :  { %253 = dma.vmem_to_hbm [thread:$0]  %s246_s27, 384, %s248_s30, [#allocation3], %s350_s4, %s350_s4, %s351_s5  }
 0x190   :  { %339 = dma.done.wait [#allocation3], 384  }
 0x191   :  { %340 = vsyncadd [#allocation3], 4294966912 }
 0x192   :  { %258 = vsyncpa [#allocation3], 1 }

</bundles_post_ra>
